<compile_context>
chip_gen: v7x
topology: tpu7x:2x2x1
jax: 0.10.0
libtpu: 0.0.40
codegen_flags: <defaults>
</compile_context>

<pallas_src>
import functools
import math

import jax
import jax.numpy as jnp
from jax.experimental import pallas as pl
from jax.experimental.pallas import tpu as pltpu


def _round_up(x, m):
    return ((x + m - 1) // m) * m


# ------------------------------------------------------------------ planning

def _fused_layer_dims(word_dim, hid_size, enc_size, num_cate):
    # (name, in_dim, out_dim); WeE2C / WeE2C2 are fused into one head of width 2*num_cate.
    return [
        ("WeC2H", 2 * word_dim, hid_size),
        ("WeH2P", hid_size, word_dim),
        ("WeP2H", word_dim, hid_size),
        ("WeH2H", hid_size, hid_size),
        ("WeH2E", hid_size, enc_size),
        ("WeE2C_fused", enc_size, 2 * num_cate),
        ("WdC2E", num_cate, enc_size),
        ("WdE2H", enc_size, hid_size),
        ("WdH2H", hid_size, hid_size),
        ("WdH2P", hid_size, word_dim),
        ("WdP2H", word_dim, hid_size),
        ("WdH2C", hid_size, 2 * word_dim),
    ]


def _plan(word_dim, hid_size, enc_size, num_cate):
    dims = _fused_layer_dims(word_dim, hid_size, enc_size, num_cate)
    max_dim = max(max(din, dout) for _, din, dout in dims)
    lane = _round_up(max(128, max_dim), 128)
    assert max_dim <= lane, "layer dims must fit a single lane-dense block"

    n_layers = len(dims)
    bias_row_off = n_layers * lane                    # one full-lane bias row per layer
    n_rows = _round_up(bias_row_off + n_layers, 8)

    # Input slab column layout: [children | eps | zero pad]
    in_cols = {"children": (0, 2 * word_dim), "eps": (2 * word_dim, num_cate)}
    assert 2 * word_dim + num_cate <= lane

    # Output slab column layout: [parent | encode | decode | scores | logvar | zero pad]
    out_cols, c = {}, 0
    for name, w in [("parent", word_dim), ("encode", num_cate),
                    ("decode", 2 * word_dim), ("scores", num_cate),
                    ("logvar", num_cate)]:
        out_cols[name] = (c, w)
        c += w
    out_used = c
    assert out_used <= lane

    return dict(dims=dims, lane=lane, n_layers=n_layers,
                bias_row_off=bias_row_off, n_rows=n_rows,
                in_cols=in_cols, out_cols=out_cols, out_used=out_used)


# ------------------------------------------------------------------ params

def make_params(key, word_dim, hid_size, enc_size, num_cate):
    """PyTorch-style init. Returns (raw per-layer dict, packed lane-dense slab)."""
    orig = [
        ("WeC2H", 2 * word_dim, hid_size),
        ("WeH2P", hid_size, word_dim),
        ("WeP2H", word_dim, hid_size),
        ("WeH2H", hid_size, hid_size),
        ("WeH2E", hid_size, enc_size),
        ("WeE2C", enc_size, num_cate),
        ("WeE2C2", enc_size, num_cate),
        ("WdC2E", num_cate, enc_size),
        ("WdE2H", enc_size, hid_size),
        ("WdH2H", hid_size, hid_size),
        ("WdH2P", hid_size, word_dim),
        ("WdP2H", word_dim, hid_size),
        ("WdH2C", hid_size, 2 * word_dim),
    ]
    keys = jax.random.split(key, len(orig))
    raw = {}
    for k, (name, din, dout) in zip(keys, orig):
        kw, kb = jax.random.split(k)
        bound = 1.0 / math.sqrt(float(din))
        w = jax.random.uniform(kw, (din, dout), jnp.float32, -bound, bound)  # [in, out]
        b = jax.random.uniform(kb, (1, dout), jnp.float32, -bound, bound)
        raw[name] = (w, b)

    # Fuse the mu / logvar heads into one wider matmul.
    fused = dict(raw)
    w_mu, b_mu = fused.pop("WeE2C")
    w_lv, b_lv = fused.pop("WeE2C2")
    fused["WeE2C_fused"] = (jnp.concatenate([w_mu, w_lv], axis=1),
                            jnp.concatenate([b_mu, b_lv], axis=1))

    plan = _plan(word_dim, hid_size, enc_size, num_cate)
    lane = plan["lane"]
    slab = jnp.zeros((plan["n_rows"], lane), jnp.float32)
    for li, (name, din, dout) in enumerate(plan["dims"]):
        w, b = fused[name]
        slab = slab.at[li * lane:li * lane + din, 0:dout].set(w)
        slab = slab.at[plan["bias_row_off"] + li, 0:dout].set(b[0])
    return raw, slab


# ------------------------------------------------------------------ kernel

def make_vae_kernel(word_dim, num_cate, plan):
    lane = plan["lane"]
    bias_off = plan["bias_row_off"]
    out_used = plan["out_used"]
    ep_c, ep_w = plan["in_cols"]["eps"]

    def kernel(in_ref, params_ref, out_ref):
        def lin(x, li):
            # Weight rows beyond x's width are zero, so we only read what x carries;
            # all slices below are sublane-aligned and full 128-lane wide.
            rows = x.shape[-1]
            w = params_ref[li * lane:li * lane + rows, :]                  # [rows, lane]
            b = params_ref[bias_off + li:bias_off + li + 1, :]             # [1, lane]
            return jnp.dot(x, w, preferred_element_type=jnp.float32) + b

        x = in_ref[...]                                # [TB, lane]: children | eps | 0-pad
        eps = in_ref[:, ep_c:ep_c + ep_w]              # [TB, num_cate]

        # ---------------- encoder ----------------
        parent = jnp.tanh(lin(jnp.tanh(lin(x, 0)), 1))   # [TB, lane], cols >= word_dim are 0
        h = jnp.tanh(lin(parent, 2))
        h = jnp.tanh(lin(h, 3))
        e = jnp.tanh(lin(h, 4))

        head = lin(e, 5)                                 # fused: mu | logvar | 0-pad
        encode = head[:, 0:num_cate]                     # mu
        logvar = head[:, num_cate:2 * num_cate]

        # stable log-softmax over the num_cate categories
        m = jnp.max(encode, axis=-1, keepdims=True)
        shifted = encode - m
        lse = jnp.log(jnp.sum(jnp.exp(shifted), axis=-1, keepdims=True))
        scores = shifted - lse

        # ---------------- reparametrize ----------------
        std = jnp.exp(0.5 * logvar)
        z = eps * std + encode                           # [TB, num_cate]

        # ---------------- decoder ----------------
        d = jnp.tanh(lin(z, 6))
        d = jnp.tanh(lin(d, 7))
        d = jnp.tanh(lin(d, 8))
        d = jnp.tanh(lin(d, 9))
        d = jnp.tanh(lin(d, 10))
        h3 = lin(d, 11)
        # sigmoid via a single EUP tanh (no divide, no approx reciprocal)
        decode = 0.5 * jnp.tanh(0.5 * h3) + 0.5          # [TB, lane]

        # ---------------- single lane-dense output store ----------------
        pieces = [parent[:, 0:word_dim], encode, decode[:, 0:2 * word_dim],
                  scores, logvar]
        pad = lane - out_used
        if pad:
            pieces.append(jnp.zeros((x.shape[0], pad), jnp.float32))
        out_ref[...] = jnp.concatenate(pieces, axis=-1).astype(out_ref.dtype)

    return kernel


# ------------------------------------------------------------------ wrapper

@functools.partial(jax.jit,
                   static_argnames=("word_dim", "hid_size", "enc_size", "num_cate"))
def vae_forward(children, eps, packed_params, *, word_dim, hid_size, enc_size, num_cate):
    plan = _plan(word_dim, hid_size, enc_size, num_cate)
    lane = plan["lane"]
    B = children.shape[0]

    # Batch tiling: one tile for small B; 128-row tiles (2-TC sharding on v7x)
    # once B grows. Weights are tiny and stay VMEM-resident across tiles.
    TB = 128 if B >= 128 else _round_up(B, 8)
    B_pad = _round_up(B, TB)

    # Pack children + eps into one lane-dense input slab.
    ch_c, ch_w = plan["in_cols"]["children"]
    ep_c, ep_w = plan["in_cols"]["eps"]
    in_slab = jnp.zeros((B_pad, lane), jnp.float32)
    in_slab = in_slab.at[:B, ch_c:ch_c + ch_w].set(children.astype(jnp.float32))
    in_slab = in_slab.at[:B, ep_c:ep_c + ep_w].set(eps.astype(jnp.float32))

    kernel = make_vae_kernel(word_dim, num_cate, plan)

    out_slab = pl.pallas_call(
        kernel,
        out_shape=jax.ShapeDtypeStruct((B_pad, lane), jnp.float32),
        grid_spec=pltpu.PrefetchScalarGridSpec(
            num_scalar_prefetch=0,
            grid=(B_pad // TB,),
            in_specs=[
                pl.BlockSpec((TB, lane), lambda i: (i, 0)),                 # activations
                pl.BlockSpec((plan["n_rows"], lane), lambda i: (0, 0)),     # resident params
            ],
            out_specs=pl.BlockSpec((TB, lane), lambda i: (i, 0)),
        ),
        compiler_params=pltpu.CompilerParams(
            dimension_semantics=("parallel",),
        ),
    )(in_slab, packed_params)

    def take(name):
        c, w = plan["out_cols"][name]
        return out_slab[:B, c:c + w]

    return take("parent"), take("encode"), take("decode"), take("scores"), take("logvar")


# ------------------------------------------------------------------ reference

def vae_reference(children, eps, raw):
    def lin(x, name):
        w, b = raw[name]
        return x @ w + b

    parent = jnp.tanh(lin(jnp.tanh(lin(children, "WeC2H")), "WeH2P"))
    h = jnp.tanh(lin(parent, "WeP2H"))
    h = jnp.tanh(lin(h, "WeH2H"))
    e = jnp.tanh(lin(h, "WeH2E"))
    encode = lin(e, "WeE2C")
    logvar = lin(e, "WeE2C2")
    scores = jax.nn.log_softmax(encode, axis=-1)
    z = eps * jnp.exp(0.5 * logvar) + encode
    d = jnp.tanh(lin(z, "WdC2E"))
    d = jnp.tanh(lin(d, "WdE2H"))
    d = jnp.tanh(lin(d, "WdH2H"))
    d = jnp.tanh(lin(d, "WdH2P"))
    d = jnp.tanh(lin(d, "WdP2H"))
    decode = jax.nn.sigmoid(lin(d, "WdH2C"))
    return parent, encode, decode, scores, logvar


# ------------------------------------------------------------------ main

if __name__ == "__main__":
    word_dim, hid_size, enc_size, num_cate = 16, 32, 16, 8
    batch = 8

    key = jax.random.PRNGKey(0)
    k_in, k_eps, k_params = jax.random.split(key, 3)

    children = jax.random.normal(k_in, (batch, 2 * word_dim), jnp.float32)
    eps = jax.random.normal(k_eps, (batch, num_cate), jnp.float32)
    raw_params, packed_params = make_params(k_params, word_dim, hid_size, enc_size, num_cate)

    parent, encode, decode, scores, logvar = jax.block_until_ready(
        vae_forward(children, eps, packed_params,
                    word_dim=word_dim, hid_size=hid_size,
                    enc_size=enc_size, num_cate=num_cate)
    )

    assert parent.shape == (batch, word_dim)
    assert encode.shape == (batch, num_cate)
    assert decode.shape == (batch, 2 * word_dim)
    assert scores.shape == (batch, num_cate)
    assert logvar.shape == (batch, num_cate)
    assert bool(jnp.all(jnp.isfinite(decode)))

    # Pure-JAX reference check.
    r_parent, r_encode, r_decode, r_scores, r_logvar = vae_reference(children, eps, raw_params)
    for name, got, want, tol in [
        ("parent", parent, r_parent, 1e-3),
        ("encode", encode, r_encode, 1e-3),
        ("scores", scores, r_scores, 1e-3),
        ("logvar", logvar, r_logvar, 1e-3),
        ("decode", decode, r_decode, 5e-3),
    ]:
        assert bool(jnp.allclose(got, want, atol=tol, rtol=tol)), f"mismatch in {name}"

    print("KERNEL_OK")
</pallas_src>

<mosaic_0001>
module attributes {stable_mosaic.version = 11 : i64} {
  func.func @kernel(%arg0: i32, %arg1: memref<8x128xf32, #tpu.memory_space<vmem>>, %arg2: memref<1552x128xf32, #tpu.memory_space<vmem>>, %arg3: memref<8x128xf32, #tpu.memory_space<vmem>>) attributes {dimension_semantics = [#tpu.dimension_semantics<parallel>], iteration_bounds = array<i64: 1>, scalar_prefetch = 0 : i64, scratch_operands = 0 : i64, tpu.core_type = #tpu.core_type<tc>, window_params = [{transform_indices = @transform_0, window_bounds = array<i64: 8, 128>}, {pipeline_mode = #tpu.pipeline_mode<synchronous>, transform_indices = @transform_1, window_bounds = array<i64: 1552, 128>}, {transform_indices = @transform_2, window_bounds = array<i64: 8, 128>}]} {
    %c0 = arith.constant 0 : index
    %c0_0 = arith.constant 0 : index
    %0 = vector.load %arg1[%c0, %c0_0] : memref<8x128xf32, #tpu.memory_space<vmem>>, vector<8x128xf32>
    %c0_1 = arith.constant 0 : index
    %c32 = arith.constant 32 : index
    %1 = vector.load %arg1[%c0_1, %c32] : memref<8x128xf32, #tpu.memory_space<vmem>>, vector<8x8xf32>
    %c0_2 = arith.constant 0 : index
    %c0_3 = arith.constant 0 : index
    %2 = vector.load %arg2[%c0_2, %c0_3] : memref<1552x128xf32, #tpu.memory_space<vmem>>, vector<128x128xf32>
    %c1536 = arith.constant 1536 : index
    %c0_4 = arith.constant 0 : index
    %3 = vector.load %arg2[%c1536, %c0_4] : memref<1552x128xf32, #tpu.memory_space<vmem>>, vector<1x128xf32>
    %cst = arith.constant dense<0.000000e+00> : vector<8x128xf32>
    %4 = tpu.matmul %0, %2, %cst {dimension_numbers = #tpu.dot_dimension_numbers<[1], [0], [0], [1], [0, 0, 1, 1], [], []>} : vector<8x128xf32>, vector<128x128xf32>, vector<8x128xf32> -> vector<8x128xf32>
    %5 = vector.broadcast %3 : vector<1x128xf32> to vector<8x128xf32>
    %6 = arith.addf %4, %5 : vector<8x128xf32>
    %7 = math.tanh %6 : vector<8x128xf32>
    %c128 = arith.constant 128 : index
    %c0_5 = arith.constant 0 : index
    %8 = vector.load %arg2[%c128, %c0_5] : memref<1552x128xf32, #tpu.memory_space<vmem>>, vector<128x128xf32>
    %c1537 = arith.constant 1537 : index
    %c0_6 = arith.constant 0 : index
    %9 = vector.load %arg2[%c1537, %c0_6] : memref<1552x128xf32, #tpu.memory_space<vmem>>, vector<1x128xf32>
    %cst_7 = arith.constant dense<0.000000e+00> : vector<8x128xf32>
    %10 = tpu.matmul %7, %8, %cst_7 {dimension_numbers = #tpu.dot_dimension_numbers<[1], [0], [0], [1], [0, 0, 1, 1], [], []>} : vector<8x128xf32>, vector<128x128xf32>, vector<8x128xf32> -> vector<8x128xf32>
    %11 = vector.broadcast %9 : vector<1x128xf32> to vector<8x128xf32>
    %12 = arith.addf %10, %11 : vector<8x128xf32>
    %13 = math.tanh %12 : vector<8x128xf32>
    %c256 = arith.constant 256 : index
    %c0_8 = arith.constant 0 : index
    %14 = vector.load %arg2[%c256, %c0_8] : memref<1552x128xf32, #tpu.memory_space<vmem>>, vector<128x128xf32>
    %c1538 = arith.constant 1538 : index
    %c0_9 = arith.constant 0 : index
    %15 = vector.load %arg2[%c1538, %c0_9] : memref<1552x128xf32, #tpu.memory_space<vmem>>, vector<1x128xf32>
    %cst_10 = arith.constant dense<0.000000e+00> : vector<8x128xf32>
    %16 = tpu.matmul %13, %14, %cst_10 {dimension_numbers = #tpu.dot_dimension_numbers<[1], [0], [0], [1], [0, 0, 1, 1], [], []>} : vector<8x128xf32>, vector<128x128xf32>, vector<8x128xf32> -> vector<8x128xf32>
    %17 = vector.broadcast %15 : vector<1x128xf32> to vector<8x128xf32>
    %18 = arith.addf %16, %17 : vector<8x128xf32>
    %19 = math.tanh %18 : vector<8x128xf32>
    %c384 = arith.constant 384 : index
    %c0_11 = arith.constant 0 : index
    %20 = vector.load %arg2[%c384, %c0_11] : memref<1552x128xf32, #tpu.memory_space<vmem>>, vector<128x128xf32>
    %c1539 = arith.constant 1539 : index
    %c0_12 = arith.constant 0 : index
    %21 = vector.load %arg2[%c1539, %c0_12] : memref<1552x128xf32, #tpu.memory_space<vmem>>, vector<1x128xf32>
    %cst_13 = arith.constant dense<0.000000e+00> : vector<8x128xf32>
    %22 = tpu.matmul %19, %20, %cst_13 {dimension_numbers = #tpu.dot_dimension_numbers<[1], [0], [0], [1], [0, 0, 1, 1], [], []>} : vector<8x128xf32>, vector<128x128xf32>, vector<8x128xf32> -> vector<8x128xf32>
    %23 = vector.broadcast %21 : vector<1x128xf32> to vector<8x128xf32>
    %24 = arith.addf %22, %23 : vector<8x128xf32>
    %25 = math.tanh %24 : vector<8x128xf32>
    %c512 = arith.constant 512 : index
    %c0_14 = arith.constant 0 : index
    %26 = vector.load %arg2[%c512, %c0_14] : memref<1552x128xf32, #tpu.memory_space<vmem>>, vector<128x128xf32>
    %c1540 = arith.constant 1540 : index
    %c0_15 = arith.constant 0 : index
    %27 = vector.load %arg2[%c1540, %c0_15] : memref<1552x128xf32, #tpu.memory_space<vmem>>, vector<1x128xf32>
    %cst_16 = arith.constant dense<0.000000e+00> : vector<8x128xf32>
    %28 = tpu.matmul %25, %26, %cst_16 {dimension_numbers = #tpu.dot_dimension_numbers<[1], [0], [0], [1], [0, 0, 1, 1], [], []>} : vector<8x128xf32>, vector<128x128xf32>, vector<8x128xf32> -> vector<8x128xf32>
    %29 = vector.broadcast %27 : vector<1x128xf32> to vector<8x128xf32>
    %30 = arith.addf %28, %29 : vector<8x128xf32>
    %31 = math.tanh %30 : vector<8x128xf32>
    %c640 = arith.constant 640 : index
    %c0_17 = arith.constant 0 : index
    %32 = vector.load %arg2[%c640, %c0_17] : memref<1552x128xf32, #tpu.memory_space<vmem>>, vector<128x128xf32>
    %c1541 = arith.constant 1541 : index
    %c0_18 = arith.constant 0 : index
    %33 = vector.load %arg2[%c1541, %c0_18] : memref<1552x128xf32, #tpu.memory_space<vmem>>, vector<1x128xf32>
    %cst_19 = arith.constant dense<0.000000e+00> : vector<8x128xf32>
    %34 = tpu.matmul %31, %32, %cst_19 {dimension_numbers = #tpu.dot_dimension_numbers<[1], [0], [0], [1], [0, 0, 1, 1], [], []>} : vector<8x128xf32>, vector<128x128xf32>, vector<8x128xf32> -> vector<8x128xf32>
    %35 = vector.broadcast %33 : vector<1x128xf32> to vector<8x128xf32>
    %36 = arith.addf %34, %35 : vector<8x128xf32>
    %37 = vector.extract_strided_slice %36 {offsets = [0, 0], sizes = [8, 8], strides = [1, 1]} : vector<8x128xf32> to vector<8x8xf32>
    %38 = vector.extract_strided_slice %36 {offsets = [0, 8], sizes = [8, 8], strides = [1, 1]} : vector<8x128xf32> to vector<8x8xf32>
    %cst_20 = arith.constant dense<0xFF800000> : vector<8xf32>
    %39 = vector.multi_reduction <maximumf>, %37, %cst_20 [1] : vector<8x8xf32> to vector<8xf32>
    %40 = vector.shape_cast %39 : vector<8xf32> to vector<8x1xf32>
    %41 = vector.broadcast %40 : vector<8x1xf32> to vector<8x8xf32>
    %42 = arith.subf %37, %41 : vector<8x8xf32>
    %43 = math.exp %42 : vector<8x8xf32>
    %cst_21 = arith.constant dense<0.000000e+00> : vector<8xf32>
    %44 = vector.multi_reduction <add>, %43, %cst_21 [1] : vector<8x8xf32> to vector<8xf32>
    %45 = vector.shape_cast %44 : vector<8xf32> to vector<8x1xf32>
    %46 = math.log %45 : vector<8x1xf32>
    %47 = vector.broadcast %46 : vector<8x1xf32> to vector<8x8xf32>
    %48 = arith.subf %42, %47 : vector<8x8xf32>
    %cst_22 = arith.constant 5.000000e-01 : f32
    %49 = vector.broadcast %cst_22 : f32 to vector<8x8xf32>
    %50 = arith.mulf %49, %38 : vector<8x8xf32>
    %51 = math.exp %50 : vector<8x8xf32>
    %52 = arith.mulf %1, %51 : vector<8x8xf32>
    %53 = arith.addf %52, %37 : vector<8x8xf32>
    %c768 = arith.constant 768 : index
    %c0_23 = arith.constant 0 : index
    %54 = vector.load %arg2[%c768, %c0_23] : memref<1552x128xf32, #tpu.memory_space<vmem>>, vector<8x128xf32>
    %c1542 = arith.constant 1542 : index
    %c0_24 = arith.constant 0 : index
    %55 = vector.load %arg2[%c1542, %c0_24] : memref<1552x128xf32, #tpu.memory_space<vmem>>, vector<1x128xf32>
    %cst_25 = arith.constant dense<0.000000e+00> : vector<8x128xf32>
    %56 = tpu.matmul %53, %54, %cst_25 {dimension_numbers = #tpu.dot_dimension_numbers<[1], [0], [0], [1], [0, 0, 1, 1], [], []>} : vector<8x8xf32>, vector<8x128xf32>, vector<8x128xf32> -> vector<8x128xf32>
    %57 = vector.broadcast %55 : vector<1x128xf32> to vector<8x128xf32>
    %58 = arith.addf %56, %57 : vector<8x128xf32>
    %59 = math.tanh %58 : vector<8x128xf32>
    %c896 = arith.constant 896 : index
    %c0_26 = arith.constant 0 : index
    %60 = vector.load %arg2[%c896, %c0_26] : memref<1552x128xf32, #tpu.memory_space<vmem>>, vector<128x128xf32>
    %c1543 = arith.constant 1543 : index
    %c0_27 = arith.constant 0 : index
    %61 = vector.load %arg2[%c1543, %c0_27] : memref<1552x128xf32, #tpu.memory_space<vmem>>, vector<1x128xf32>
    %cst_28 = arith.constant dense<0.000000e+00> : vector<8x128xf32>
    %62 = tpu.matmul %59, %60, %cst_28 {dimension_numbers = #tpu.dot_dimension_numbers<[1], [0], [0], [1], [0, 0, 1, 1], [], []>} : vector<8x128xf32>, vector<128x128xf32>, vector<8x128xf32> -> vector<8x128xf32>
    %63 = vector.broadcast %61 : vector<1x128xf32> to vector<8x128xf32>
    %64 = arith.addf %62, %63 : vector<8x128xf32>
    %65 = math.tanh %64 : vector<8x128xf32>
    %c1024 = arith.constant 1024 : index
    %c0_29 = arith.constant 0 : index
    %66 = vector.load %arg2[%c1024, %c0_29] : memref<1552x128xf32, #tpu.memory_space<vmem>>, vector<128x128xf32>
    %c1544 = arith.constant 1544 : index
    %c0_30 = arith.constant 0 : index
    %67 = vector.load %arg2[%c1544, %c0_30] : memref<1552x128xf32, #tpu.memory_space<vmem>>, vector<1x128xf32>
    %cst_31 = arith.constant dense<0.000000e+00> : vector<8x128xf32>
    %68 = tpu.matmul %65, %66, %cst_31 {dimension_numbers = #tpu.dot_dimension_numbers<[1], [0], [0], [1], [0, 0, 1, 1], [], []>} : vector<8x128xf32>, vector<128x128xf32>, vector<8x128xf32> -> vector<8x128xf32>
    %69 = vector.broadcast %67 : vector<1x128xf32> to vector<8x128xf32>
    %70 = arith.addf %68, %69 : vector<8x128xf32>
    %71 = math.tanh %70 : vector<8x128xf32>
    %c1152 = arith.constant 1152 : index
    %c0_32 = arith.constant 0 : index
    %72 = vector.load %arg2[%c1152, %c0_32] : memref<1552x128xf32, #tpu.memory_space<vmem>>, vector<128x128xf32>
    %c1545 = arith.constant 1545 : index
    %c0_33 = arith.constant 0 : index
    %73 = vector.load %arg2[%c1545, %c0_33] : memref<1552x128xf32, #tpu.memory_space<vmem>>, vector<1x128xf32>
    %cst_34 = arith.constant dense<0.000000e+00> : vector<8x128xf32>
    %74 = tpu.matmul %71, %72, %cst_34 {dimension_numbers = #tpu.dot_dimension_numbers<[1], [0], [0], [1], [0, 0, 1, 1], [], []>} : vector<8x128xf32>, vector<128x128xf32>, vector<8x128xf32> -> vector<8x128xf32>
    %75 = vector.broadcast %73 : vector<1x128xf32> to vector<8x128xf32>
    %76 = arith.addf %74, %75 : vector<8x128xf32>
    %77 = math.tanh %76 : vector<8x128xf32>
    %c1280 = arith.constant 1280 : index
    %c0_35 = arith.constant 0 : index
    %78 = vector.load %arg2[%c1280, %c0_35] : memref<1552x128xf32, #tpu.memory_space<vmem>>, vector<128x128xf32>
    %c1546 = arith.constant 1546 : index
    %c0_36 = arith.constant 0 : index
    %79 = vector.load %arg2[%c1546, %c0_36] : memref<1552x128xf32, #tpu.memory_space<vmem>>, vector<1x128xf32>
    %cst_37 = arith.constant dense<0.000000e+00> : vector<8x128xf32>
    %80 = tpu.matmul %77, %78, %cst_37 {dimension_numbers = #tpu.dot_dimension_numbers<[1], [0], [0], [1], [0, 0, 1, 1], [], []>} : vector<8x128xf32>, vector<128x128xf32>, vector<8x128xf32> -> vector<8x128xf32>
    %81 = vector.broadcast %79 : vector<1x128xf32> to vector<8x128xf32>
    %82 = arith.addf %80, %81 : vector<8x128xf32>
    %83 = math.tanh %82 : vector<8x128xf32>
    %c1408 = arith.constant 1408 : index
    %c0_38 = arith.constant 0 : index
    %84 = vector.load %arg2[%c1408, %c0_38] : memref<1552x128xf32, #tpu.memory_space<vmem>>, vector<128x128xf32>
    %c1547 = arith.constant 1547 : index
    %c0_39 = arith.constant 0 : index
    %85 = vector.load %arg2[%c1547, %c0_39] : memref<1552x128xf32, #tpu.memory_space<vmem>>, vector<1x128xf32>
    %cst_40 = arith.constant dense<0.000000e+00> : vector<8x128xf32>
    %86 = tpu.matmul %83, %84, %cst_40 {dimension_numbers = #tpu.dot_dimension_numbers<[1], [0], [0], [1], [0, 0, 1, 1], [], []>} : vector<8x128xf32>, vector<128x128xf32>, vector<8x128xf32> -> vector<8x128xf32>
    %87 = vector.broadcast %85 : vector<1x128xf32> to vector<8x128xf32>
    %88 = arith.addf %86, %87 : vector<8x128xf32>
    %cst_41 = arith.constant 5.000000e-01 : f32
    %89 = vector.broadcast %cst_41 : f32 to vector<8x128xf32>
    %90 = arith.mulf %89, %88 : vector<8x128xf32>
    %91 = math.tanh %90 : vector<8x128xf32>
    %cst_42 = arith.constant 5.000000e-01 : f32
    %92 = vector.broadcast %cst_42 : f32 to vector<8x128xf32>
    %93 = arith.mulf %92, %91 : vector<8x128xf32>
    %cst_43 = arith.constant 5.000000e-01 : f32
    %94 = vector.broadcast %cst_43 : f32 to vector<8x128xf32>
    %95 = arith.addf %93, %94 : vector<8x128xf32>
    %96 = vector.extract_strided_slice %13 {offsets = [0, 0], sizes = [8, 16], strides = [1, 1]} : vector<8x128xf32> to vector<8x16xf32>
    %97 = vector.extract_strided_slice %95 {offsets = [0, 0], sizes = [8, 32], strides = [1, 1]} : vector<8x128xf32> to vector<8x32xf32>
    %cst_44 = arith.constant 0.000000e+00 : f32
    %98 = vector.broadcast %cst_44 : f32 to vector<8x56xf32>
    %99 = tpu.concatenate %96, %37, %97, %48, %38, %98 in 1 : vector<8x16xf32>, vector<8x8xf32>, vector<8x32xf32>, vector<8x8xf32>, vector<8x8xf32>, vector<8x56xf32> -> vector<8x128xf32>
    %c0_45 = arith.constant 0 : index
    %c0_46 = arith.constant 0 : index
    %100 = vector.load %arg3[%c0_45, %c0_46] : memref<8x128xf32, #tpu.memory_space<vmem>>, vector<8x128xf32>
    tpu.vector_store %arg3[%c0_45, %c0_46], %99 {strides = array<i32>} : memref<8x128xf32, #tpu.memory_space<vmem>>, vector<8x128xf32>,
    return
  }
  func.func @transform_0(%arg0: i32) -> (i32, i32) {
    %c0_i32 = arith.constant 0 : i32
    %c0_i32_0 = arith.constant 0 : i32
    return %arg0, %c0_i32 : i32, i32
  }
  func.func @transform_1(%arg0: i32) -> (i32, i32) {
    %c0_i32 = arith.constant 0 : i32
    %c0_i32_0 = arith.constant 0 : i32
    %c0_i32_1 = arith.constant 0 : i32
    return %c0_i32, %c0_i32_0 : i32, i32
  }
  func.func @transform_2(%arg0: i32) -> (i32, i32) {
    %c0_i32 = arith.constant 0 : i32
    %c0_i32_0 = arith.constant 0 : i32
    return %arg0, %c0_i32 : i32, i32
  }
}

</mosaic_0001>

<bundles_post_ra>
// kernel: vae_forward.1
= control target key start
LH: loop header
LB: loop body
LE: loop exit
PB: predicated region body
PF: predicated region fallthrough
CT: control target
= control target key end

     0   :  { %7 = vsyncpa [#allocation3], 0  ;;  %s2097_s9 = smov [#allocation2]   ;;  %s2281_s0 = inlined_call_operand.vmem [shape: f32[8,128], index: 0, kind: input, shape index: {}]   ;;  %s2282_s1 = inlined_call_operand.hbm [shape: f32[1552,128], index: 1, kind: input, shape index: {}]   ;;  %s2283_s2 = inlined_call_operand.vmem [shape: f32[8,128], index: 2, kind: output, shape index: {}]  }
   0x1   :  { %s15_s10 = sshll.u32 %s2097_s9, 4  ;;  %s2073_s13 = scalar_lea.hbm %s2282_s1, 24832  ;;  %s16_s10 = int_to_ptr.vmem [resolvable:$true] %s15_s10 }
   0x2   :  { %p2074_p0 = scmp.ne.s32.totalorder %s2282_s1, %s2073_s13  ;;  %p2077_p1 = scmp.lt.u32.totalorder %s2073_s13, %s2282_s1 }
   0x4   :  { %p2079_p2 = pnand %p2077_p1, %p2074_p0 }
   0x6   :  { %2082 = shalt.err (!%p2079_p2)
}
   0x7   :  { %s2083_s18 = scalar_lea.vmem %s16_s10, 24832  ;;  %p2088_p4 = scmp.lt.s32.totalorder %s16_s10, %s16_s10 }
   0x8   :  { %p2084_p3 = scmp.ne.s32.totalorder %s16_s10, %s2083_s18  ;;  %p2089_p5 = scmp.lt.s32.totalorder %s2083_s18, %s2083_s18 }
   0xa   :  { %p2090_p6 = por %p2089_p5, %p2088_p4 }
   0xc   :  { %p2091_p7 = pnand %p2090_p6, %p2084_p3 }
   0xe   :  { %2094 = shalt.err (!%p2091_p7)
}
   0xf   :  { %s2098_s19 = smov 128   ;;  %s2099_s20 = smov 8  }
  0x10   :  { %21 = dma.hbm_to_vmem [thread:$0]  %s2282_s1, 24832, %s16_s10, [#allocation3], %s2098_s19, %s2098_s19, %s2099_s20  }
  0x11   :  { %2095 = dma.done.wait [#allocation3], 24832  }
  0x12   :  { %2096 = vsyncadd [#allocation3], 4294942464  ;;  %v2100_v0 = vmov 0.0|0.0   ;;  %vm2101_vm0 = vmmov 0   ;;  %v2102_v1 = vmov 0.0   ;;  %v26_v2 = vld [vmem:[#allocation2] sm:$0xff] }
  0x13   :  { %1770 = vmatprep.subr.bf16.mxu0 %v2100_v0  ;;  %1412 = vmatprep.mubr.msk.f32.mxu0 %vm2101_vm0, %v2102_v1  ;;  %v27_v3 = vld [vmem:[#allocation2 + $0x8] sm:$0xff]  ;;  %v28_v4 = vld [vmem:[#allocation2 + $0x10] sm:$0xff]  ;;  %v29_v6 = vld [vmem:[#allocation2 + $0x18] sm:$0xff]  ;;  %s2104_s24 = smov 32   ;;  %s2105_s25 = smov 96   ;;  %vm577_vm1 = vcmask 64512  }
  0x14   :  { %1794 = vmatprep.subr.bf16.mxu1 %v2100_v0  ;;  %1447 = vmatprep.mubr.msk.f32.mxu1 %vm2101_vm0, %v2102_v1  ;;  %v1771_v5 = vpack.c.bf16 %v27_v3, %v26_v2  ;;  %v1774_v7 = vpack.c.bf16 %v29_v6, %v28_v4  ;;  %v30_v8 = vld [vmem:[#allocation2 + $0x20] sm:$0xff]  ;;  %v31_v9 = vld [vmem:[#allocation2 + $0x28] sm:$0xff]  ;;  %v120_v12 = vld [vmem:[#allocation2 + $0x90] sm:$0xff]  ;;  %s2106_s26 = smov 16   ;;  %s2107_s27 = smov 56   ;;  %vm1162_vm2 = vcmask 130048  }
  0x15   :  { %v118_v10 = vld [vmem:[#allocation2 + $0x80] sm:$0xff]  ;;  %v119_v11 = vld [vmem:[#allocation2 + $0x88] sm:$0xff]  ;;  %v121_v13 = vld [vmem:[#allocation2 + $0x98] sm:$0xff]  ;;  %v1777_v14 = vpack.c.bf16 %v31_v9, %v30_v8  ;;  %vm1164_vm3 = vcmask 195584   ;;  %vm1166_vm4 = vcmask 457728   ;;  %vm1168_vm5 = vcmask 523264  }
  0x16   :  { %1772 = vmatpush3.bf16.msra.mxu0 %v1771_v5  ;;  %v1795_v15 = vpack.c.bf16 %v119_v11, %v118_v10  ;;  %v32_v16 = vld [vmem:[#allocation2 + $0x30] sm:$0xff]  ;;  %v33_v17 = vld [vmem:[#allocation2 + $0x38] sm:$0xff]  ;;  %v1798_v18 = vpack.c.bf16 %v121_v13, %v120_v12  ;;  %v122_v19 = vld [vmem:[#allocation2 + $0xa0] sm:$0xff]  ;;  %vm1170_vm6 = vcmask 588800  }
  0x17   :  { %1773 = vmatprep.subr.bf16.mxu0 %v2100_v0  ;;  %v123_v20 = vld [vmem:[#allocation2 + $0xa8] sm:$0xff]  ;;  %v1780_v21 = vpack.c.bf16 %v33_v17, %v32_v16  ;;  %v34_v22 = vld [vmem:[#allocation2 + $0x40] sm:$0xff]  ;;  %v124_v25 = vld [vmem:[#allocation2 + $0xb0] sm:$0xff] }
  0x18   :  { %1796 = vmatpush3.bf16.msra.mxu1 %v1795_v15  ;;  %v35_v23 = vld [vmem:[#allocation2 + $0x48] sm:$0xff]  ;;  %v1801_v24 = vpack.c.bf16 %v123_v20, %v122_v19  ;;  %v125_v26 = vld [vmem:[#allocation2 + $0xb8] sm:$0xff]  ;;  %v36_v28 = vld [vmem:[#allocation2 + $0x50] sm:$0xff] }
  0x19   :  { %1797 = vmatprep.subr.bf16.mxu1 %v2100_v0  ;;  %v1783_v27 = vpack.c.bf16 %v35_v23, %v34_v22  ;;  %v37_v29 = vld [vmem:[#allocation2 + $0x58] sm:$0xff]  ;;  %v1804_v30 = vpack.c.bf16 %v125_v26, %v124_v25  ;;  %v126_v31 = vld [vmem:[#allocation2 + $0xc0] sm:$0xff]  ;;  %v127_v32 = vld [vmem:[#allocation2 + $0xc8] sm:$0xff] }
  0x1a   :  { %1775 = vmatpush3.bf16.msra.mxu0 %v1774_v7  ;;  %v1786_v33 = vpack.c.bf16 %v37_v29, %v36_v28  ;;  %v38_v34 = vld [vmem:[#allocation2 + $0x60] sm:$0xff]  ;;  %v39_v35 = vld [vmem:[#allocation2 + $0x68] sm:$0xff]  ;;  %v1807_v36 = vpack.c.bf16 %v127_v32, %v126_v31  ;;  %v40_v38 = vld [vmem:[#allocation2 + $0x70] sm:$0xff] }
  0x1b   :  { %1776 = vmatprep.subr.bf16.mxu0 %v2100_v0  ;;  %v1789_v37 = vpack.c.bf16 %v39_v35, %v38_v34  ;;  %v41_v39 = vld [vmem:[#allocation2 + $0x78] sm:$0xff]  ;;  %v2156_v41 = vld [vmem:[%s2281_s0] sm:$0xff]  ;;  %v128_v42 = vld [vmem:[#allocation2 + $0xd0] sm:$0xff]  ;;  %s2103_s0 = smov 24  }
  0x1c   :  { %1799 = vmatpush3.bf16.msra.mxu1 %v1798_v18  ;;  %v1792_v40 = vpack.c.bf16 %v41_v39, %v40_v38  ;;  %v129_v43 = vld [vmem:[#allocation2 + $0xd8] sm:$0xff]  ;;  %v130_v45 = vld [vmem:[#allocation2 + $0xe0] sm:$0xff]  ;;  %v131_v46 = vld [vmem:[#allocation2 + $0xe8] sm:$0xff] }
  0x1d   :  { %1800 = vmatprep.subr.bf16.mxu1 %v2100_v0  ;;  %v1810_v44 = vpack.c.bf16 %v129_v43, %v128_v42  ;;  %v1813_v47 = vpack.c.bf16 %v131_v46, %v130_v45  ;;  %v132_v48 = vld [vmem:[#allocation2 + $0xf0] sm:$0xff]  ;;  %v133_v49 = vld [vmem:[#allocation2 + $0xf8] sm:$0xff]  ;;  %v210_v51 = vld [vmem:[#allocation2 + $0x100] sm:$0xff] }
  0x1e   :  { %1778 = vmatpush3.bf16.msra.mxu0 %v1777_v14  ;;  %v1816_v50 = vpack.c.bf16 %v133_v49, %v132_v48  ;;  %v211_v52 = vld [vmem:[#allocation2 + $0x108] sm:$0xff]  ;;  %v212_v53 = vld [vmem:[#allocation2 + $0x110] sm:$0xff]  ;;  %v213_v55 = vld [vmem:[#allocation2 + $0x118] sm:$0xff] }
  0x1f   :  { %1779 = vmatprep.subr.bf16.mxu0 %v2100_v0  ;;  %v1819_v54 = vpack.c.bf16 %v211_v52, %v210_v51  ;;  %v1822_v56 = vpack.c.bf16 %v213_v55, %v212_v53  ;;  %v214_v57 = vld [vmem:[#allocation2 + $0x120] sm:$0xff]  ;;  %v215_v58 = vld [vmem:[#allocation2 + $0x128] sm:$0xff]  ;;  %v216_v60 = vld [vmem:[#allocation2 + $0x130] sm:$0xff] }
  0x20   :  { %1802 = vmatpush3.bf16.msra.mxu1 %v1801_v24  ;;  %v1825_v59 = vpack.c.bf16 %v215_v58, %v214_v57  ;;  %v217_v61 = vld [vmem:[#allocation2 + $0x138] sm:$0xff]  ;;  %v218_v63 = vld [vmem:[#allocation2 + $0x140] sm:$0xff]  ;;  %v219_v2 = vld [vmem:[#allocation2 + $0x148] sm:$0xff] }
  0x21   :  { %1803 = vmatprep.subr.bf16.mxu1 %v2100_v0  ;;  %v1828_v62 = vpack.c.bf16 %v217_v61, %v216_v60  ;;  %v1831_v3 = vpack.c.bf16 %v219_v2, %v218_v63  ;;  %v1178_v4 = vld [vmem:[#allocation2 + $0x600] ss:$0 sm:$0xff]  ;;  %v220_v9 = vld [vmem:[#allocation2 + $0x150] sm:$0xff]  ;;  %v221_v10 = vld [vmem:[#allocation2 + $0x158] sm:$0xff] }
  0x22   :  { %1781 = vmatpush3.bf16.msra.mxu0 %v1780_v21  ;;  %v1834_v11 = vpack.c.bf16 %v221_v10, %v220_v9  ;;  %v222_v12 = vld [vmem:[#allocation2 + $0x160] sm:$0xff]  ;;  %v223_v13 = vld [vmem:[#allocation2 + $0x168] sm:$0xff]  ;;  %v224_v15 = vld [vmem:[#allocation2 + $0x170] sm:$0xff] }
  0x23   :  { %1782 = vmatprep.subr.bf16.mxu0 %v2100_v0  ;;  %v1837_v14 = vpack.c.bf16 %v223_v13, %v222_v12  ;;  %v225_v16 = vld [vmem:[#allocation2 + $0x178] sm:$0xff]  ;;  %v302_v18 = vld [vmem:[#allocation2 + $0x180] sm:$0xff]  ;;  %v303_v19 = vld [vmem:[#allocation2 + $0x188] sm:$0xff] }
  0x24   :  { %1805 = vmatpush3.bf16.msra.mxu1 %v1804_v30  ;;  %v1840_v17 = vpack.c.bf16 %v225_v16, %v224_v15  ;;  %v304_v20 = vld [vmem:[#allocation2 + $0x190] sm:$0xff]  ;;  %v1843_v21 = vpack.c.bf16 %v303_v19, %v302_v18  ;;  %v305_v22 = vld [vmem:[#allocation2 + $0x198] sm:$0xff]  ;;  %v306_v24 = vld [vmem:[#allocation2 + $0x1a0] sm:$0xff] }
  0x25   :  { %1806 = vmatprep.subr.bf16.mxu1 %v2100_v0  ;;  %v1846_v23 = vpack.c.bf16 %v305_v22, %v304_v20  ;;  %v307_v25 = vld [vmem:[#allocation2 + $0x1a8] sm:$0xff]  ;;  %v309_v28 = vld [vmem:[#allocation2 + $0x1b8] sm:$0xff]  ;;  %v310_v30 = vld [vmem:[#allocation2 + $0x1c0] sm:$0xff] }
  0x26   :  { %1784 = vmatpush3.bf16.msra.mxu0 %v1783_v27  ;;  %v1849_v26 = vpack.c.bf16 %v307_v25, %v306_v24  ;;  %v308_v27 = vld [vmem:[#allocation2 + $0x1b0] sm:$0xff]  ;;  %v311_v31 = vld [vmem:[#allocation2 + $0x1c8] sm:$0xff]  ;;  %v313_v39 = vld [vmem:[#allocation2 + $0x1d8] sm:$0xff] }
  0x27   :  { %1785 = vmatprep.subr.bf16.mxu0 %v2100_v0  ;;  %v1852_v29 = vpack.c.bf16 %v309_v28, %v308_v27  ;;  %v1855_v32 = vpack.c.bf16 %v311_v31, %v310_v30  ;;  %v312_v38 = vld [vmem:[#allocation2 + $0x1d0] sm:$0xff]  ;;  %v314_v42 = vld [vmem:[#allocation2 + $0x1e0] sm:$0xff]  ;;  %v315_v43 = vld [vmem:[#allocation2 + $0x1e8] sm:$0xff] }
  0x28   :  { %1808 = vmatpush3.bf16.msra.mxu1 %v1807_v36  ;;  %v316_v45 = vld [vmem:[#allocation2 + $0x1f0] sm:$0xff]  ;;  %v317_v46 = vld [vmem:[#allocation2 + $0x1f8] sm:$0xff]  ;;  %v394_v48 = vld [vmem:[#allocation2 + $0x200] sm:$0xff] }
  0x29   :  { %1809 = vmatprep.subr.bf16.mxu1 %v2100_v0  ;;  %v395_v49 = vld [vmem:[#allocation2 + $0x208] sm:$0xff]  ;;  %v397_v52 = vld [vmem:[#allocation2 + $0x218] sm:$0xff]  ;;  %v400_v57 = vld [vmem:[#allocation2 + $0x230] sm:$0xff] }
  0x2a   :  { %1787 = vmatpush3.bf16.msra.mxu0 %v1786_v33  ;;  %v1179_v33 = vld [vmem:[#allocation2 + $0x601] ss:$0 sm:$0xff]  ;;  %v1867_v51 = vpack.c.bf16 %v395_v49, %v394_v48  ;;  %v399_v55 = vld [vmem:[#allocation2 + $0x228] sm:$0xff]  ;;  %v401_v58 = vld [vmem:[#allocation2 + $0x238] sm:$0xff] }
  0x2b   :  { %1788 = vmatprep.subr.bf16.mxu0 %v2100_v0  ;;  %v402_v60 = vld [vmem:[#allocation2 + $0x240] sm:$0xff]  ;;  %v403_v61 = vld [vmem:[#allocation2 + $0x248] sm:$0xff]  ;;  %v408_v12 = vld [vmem:[#allocation2 + $0x270] sm:$0xff] }
  0x2c   :  { %1811 = vmatpush3.bf16.msra.mxu1 %v1810_v44  ;;  %v1861_v44 = vpack.c.bf16 %v315_v43, %v314_v42  ;;  %v1180_v63 = vld [vmem:[#allocation2 + $0x602] ss:$0 sm:$0xff]  ;;  %v407_v10 = vld [vmem:[#allocation2 + $0x268] sm:$0xff]  ;;  %v409_v13 = vld [vmem:[#allocation2 + $0x278] sm:$0xff] }
  0x2d   :  { %1812 = vmatprep.subr.bf16.mxu1 %v2100_v0  ;;  %v406_v9 = vld [vmem:[#allocation2 + $0x260] sm:$0xff]  ;;  %v487_v16 = vld [vmem:[#allocation2 + $0x288] sm:$0xff]  ;;  %v489_v19 = vld [vmem:[#allocation2 + $0x298] sm:$0xff] }
  0x2e   :  { %1790 = vmatpush3.bf16.msra.mxu0 %v1789_v37  ;;  %v486_v15 = vld [vmem:[#allocation2 + $0x280] sm:$0xff]  ;;  %v491_v22 = vld [vmem:[#allocation2 + $0x2a8] sm:$0xff]  ;;  %v492_v24 = vld [vmem:[#allocation2 + $0x2b0] sm:$0xff] }
  0x2f   :  { %1791 = vmatprep.subr.bf16.mxu0 %v2100_v0  ;;  %v1891_v18 = vpack.c.bf16 %v487_v16, %v486_v15  ;;  %v493_v25 = vld [vmem:[#allocation2 + $0x2b8] sm:$0xff]  ;;  %v494_v27 = vld [vmem:[#allocation2 + $0x2c0] sm:$0xff]  ;;  %v495_v28 = vld [vmem:[#allocation2 + $0x2c8] sm:$0xff] }
  0x30   :  { %1814 = vmatpush3.bf16.msra.mxu1 %v1813_v47  ;;  %v1864_v47 = vpack.c.bf16 %v317_v46, %v316_v45  ;;  %v1181_v30 = vld [vmem:[#allocation2 + $0x603] ss:$0 sm:$0xff]  ;;  %v500_v43 = vld [vmem:[#allocation2 + $0x2f0] sm:$0xff]  ;;  %v1182_v46 = vld [vmem:[#allocation2 + $0x604] ss:$0 sm:$0xff] }
  0x31   :  { %1815 = vmatprep.subr.bf16.mxu1 %v2100_v0 }
  0x32   :  { %1793 = vmatpush3.bf16.msra.mxu0 %v1792_v40  ;;  %v1858_v40 = vpack.c.bf16 %v313_v39, %v312_v38  ;;  %v498_v39 = vld [vmem:[#allocation2 + $0x2e0] sm:$0xff] }
  0x33   :  { %1818 = vmatprep.subr.bf16.mxu0 %v2100_v0 }
  0x34   :  { %1817 = vmatpush3.bf16.msra.mxu1 %v1816_v50  ;;  %v396_v50 = vld [vmem:[#allocation2 + $0x210] sm:$0xff] }
  0x35   :  { %1413 = vmatmul.mubr.f32.vlgmr.msra.gmra.mrb[0].mxu0 %v2156_v41  ;;  %1842 = vmatprep.subr.bf16.mxu1 %v2100_v0  ;;  %v1870_v53 = vpack.c.bf16 %v397_v52, %v396_v50 }
  0x36   :  { %1482 = vmatprep.mubr.msk.f32.mxu0 %vm2101_vm0, %v2102_v1  ;;  %1820 = vmatpush3.bf16.msra.mxu0 %v1819_v54  ;;  %v398_v54 = vld [vmem:[#allocation2 + $0x220] sm:$0xff] }
  0x37   :  { %1821 = vmatprep.subr.bf16.mxu0 %v2100_v0 }
  0x3a   :  { %1823 = vmatpush3.bf16.msra.mxu0 %v1822_v56  ;;  %v1873_v56 = vpack.c.bf16 %v399_v55, %v398_v54 }
  0x3b   :  { %1824 = vmatprep.subr.bf16.mxu0 %v2100_v0 }
  0x3e   :  { %1826 = vmatpush3.bf16.msra.mxu0 %v1825_v59  ;;  %v1876_v59 = vpack.c.bf16 %v401_v58, %v400_v57  ;;  %v603_v58 = vld [vmem:[#allocation2 + $0x300] sm:$0xff] }
  0x3f   :  { %1827 = vmatprep.subr.bf16.mxu0 %v2100_v0 }
  0x42   :  { %1829 = vmatpush3.bf16.msra.mxu0 %v1828_v62  ;;  %v1879_v62 = vpack.c.bf16 %v403_v61, %v402_v60 }
  0x43   :  { %1830 = vmatprep.subr.bf16.mxu0 %v2100_v0 }
  0x46   :  { %1832 = vmatpush3.bf16.msra.mxu0 %v1831_v3 }
  0x47   :  { %1833 = vmatprep.subr.bf16.mxu0 %v2100_v0 }
  0x4a   :  { %1835 = vmatpush3.bf16.msra.mxu0 %v1834_v11  ;;  %v1885_v11 = vpack.c.bf16 %v407_v10, %v406_v9  ;;  %v691_v10 = vld [vmem:[#allocation2 + $0x3b0] sm:$0xff] }
  0x4b   :  { %1836 = vmatprep.subr.bf16.mxu0 %v2100_v0 }
  0x4e   :  { %1838 = vmatpush3.bf16.msra.mxu0 %v1837_v14  ;;  %v1888_v14 = vpack.c.bf16 %v409_v13, %v408_v12  ;;  %v693_v13 = vld [vmem:[#allocation2 + $0x3c0] sm:$0xff] }
  0x4f   :  { %1839 = vmatprep.subr.bf16.mxu0 %v2100_v0 }
  0x52   :  { %1841 = vmatpush3.bf16.msra.mxu0 %v1840_v17  ;;  %v488_v17 = vld [vmem:[#allocation2 + $0x290] sm:$0xff] }
  0x53   :  { %1866 = vmatprep.subr.bf16.mxu0 %v2100_v0  ;;  %v1894_v20 = vpack.c.bf16 %v489_v19, %v488_v17 }
 0x108   :  { %v113_v5 = vpop.f32.mrb[0].mxu0 }
 0x109   :  { %v114_v6 = vadd.f32 %v1178_v4, %v113_v5  ;;  %v1414_v7 = vpop.f32.mrb[1].mxu0 }
 0x10a   :  { %v405_v7 = vld [vmem:[#allocation2 + $0x258] sm:$0xff] }
 0x10b   :  { %2045 = vtanh.f32 %v114_v6  ;;  %v404_v6 = vld [vmem:[#allocation2 + $0x250] sm:$0xff] }
 0x115   :  { %v2046_v8 = vpop.eup %2045 }
 0x116   :  { %1448 = vmatmul.mubr.f32.vlgmr.msra.gmra.mrb[0].mxu1 %v2046_v8  ;;  %v1882_v8 = vpack.c.bf16 %v405_v7, %v404_v6  ;;  %v688_v6 = vld [vmem:[#allocation2 + $0x398] sm:$0xff] }
 0x117   :  { %1517 = vmatprep.mubr.msk.f32.mxu1 %vm2101_vm0, %v2102_v1  ;;  %1844 = vmatpush3.bf16.msra.mxu1 %v1843_v21  ;;  %v490_v21 = vld [vmem:[#allocation2 + $0x2a0] sm:$0xff] }
 0x118   :  { %1845 = vmatprep.subr.bf16.mxu1 %v2100_v0 }
 0x11b   :  { %1847 = vmatpush3.bf16.msra.mxu1 %v1846_v23  ;;  %v1897_v23 = vpack.c.bf16 %v491_v22, %v490_v21  ;;  %v695_v22 = vld [vmem:[#allocation2 + $0x3d0] sm:$0xff] }
 0x11c   :  { %1848 = vmatprep.subr.bf16.mxu1 %v2100_v0 }
 0x11f   :  { %1850 = vmatpush3.bf16.msra.mxu1 %v1849_v26  ;;  %v1900_v26 = vpack.c.bf16 %v493_v25, %v492_v24  ;;  %v697_v25 = vld [vmem:[#allocation2 + $0x3e0] sm:$0xff] }
 0x120   :  { %1851 = vmatprep.subr.bf16.mxu1 %v2100_v0 }
 0x123   :  { %1853 = vmatpush3.bf16.msra.mxu1 %v1852_v29  ;;  %v1903_v29 = vpack.c.bf16 %v495_v28, %v494_v27  ;;  %v699_v28 = vld [vmem:[#allocation2 + $0x3f0] sm:$0xff] }
 0x124   :  { %1854 = vmatprep.subr.bf16.mxu1 %v2100_v0 }
 0x127   :  { %1856 = vmatpush3.bf16.msra.mxu1 %v1855_v32 }
 0x128   :  { %1857 = vmatprep.subr.bf16.mxu1 %v2100_v0 }
 0x12b   :  { %1859 = vmatpush3.bf16.msra.mxu1 %v1858_v40  ;;  %v499_v40 = vld [vmem:[#allocation2 + $0x2e8] sm:$0xff] }
 0x12c   :  { %1860 = vmatprep.subr.bf16.mxu1 %v2100_v0  ;;  %v1909_v42 = vpack.c.bf16 %v499_v40, %v498_v39  ;;  %v782_v39 = vld [vmem:[#allocation2 + $0x428] sm:$0xff] }
 0x12f   :  { %1862 = vmatpush3.bf16.msra.mxu1 %v1861_v44  ;;  %v501_v44 = vld [vmem:[#allocation2 + $0x2f8] sm:$0xff] }
 0x130   :  { %1863 = vmatprep.subr.bf16.mxu1 %v2100_v0  ;;  %v1912_v45 = vpack.c.bf16 %v501_v44, %v500_v43  ;;  %v784_v43 = vld [vmem:[#allocation2 + $0x438] sm:$0xff] }
 0x133   :  { %1865 = vmatpush3.bf16.msra.mxu1 %v1864_v47 }
 0x134   :  { %1890 = vmatprep.subr.bf16.mxu1 %v2100_v0 }
 0x1e9   :  { %v205_v34 = vpop.f32.mrb[0].mxu1 }
 0x1ea   :  { %v206_v35 = vadd.f32 %v1179_v33, %v205_v34  ;;  %v1449_v36 = vpop.f32.mrb[1].mxu1 }
 0x1eb   :  { %v497_v36 = vld [vmem:[#allocation2 + $0x2d8] sm:$0xff] }
 0x1ec   :  { %2047 = vtanh.f32 %v206_v35  ;;  %v496_v35 = vld [vmem:[#allocation2 + $0x2d0] sm:$0xff] }
 0x1ed   :  { %v1906_v38 = vpack.c.bf16 %v497_v36, %v496_v35  ;;  %v780_v35 = vld [vmem:[#allocation2 + $0x418] sm:$0xff] }
 0x1f6   :  { %v2180_v37 = vpop.eup %2047 }
 0x1f7   :  { %1483 = vmatmul.mubr.f32.vlgmr.msra.gmra.mrb[2].mxu0 %v2180_v37 }
 0x1f8   :  { %1552 = vmatprep.mubr.msk.f32.mxu0 %vm2101_vm0, %v2102_v1  ;;  %1868 = vmatpush3.bf16.msra.mxu0 %v1867_v51  ;;  %v1183_v51 = vld [vmem:[#allocation2 + $0x605] ss:$0 sm:$0xff] }
 0x1f9   :  { %1869 = vmatprep.subr.bf16.mxu0 %v2100_v0 }
 0x1fc   :  { %1871 = vmatpush3.bf16.msra.mxu0 %v1870_v53 }
 0x1fd   :  { %1872 = vmatprep.subr.bf16.mxu0 %v2100_v0 }
 0x200   :  { %1874 = vmatpush3.bf16.msra.mxu0 %v1873_v56 }
 0x201   :  { %1875 = vmatprep.subr.bf16.mxu0 %v2100_v0 }
 0x204   :  { %1877 = vmatpush3.bf16.msra.mxu0 %v1876_v59 }
 0x205   :  { %1878 = vmatprep.subr.bf16.mxu0 %v2100_v0 }
 0x208   :  { %1880 = vmatpush3.bf16.msra.mxu0 %v1879_v62 }
 0x209   :  { %1881 = vmatprep.subr.bf16.mxu0 %v2100_v0 }
 0x20c   :  { %1883 = vmatpush3.bf16.msra.mxu0 %v1882_v8  ;;  %v689_v8 = vld [vmem:[#allocation2 + $0x3a0] sm:$0xff] }
 0x20d   :  { %1884 = vmatprep.subr.bf16.mxu0 %v2100_v0 }
 0x210   :  { %1886 = vmatpush3.bf16.msra.mxu0 %v1885_v11  ;;  %v692_v11 = vld [vmem:[#allocation2 + $0x3b8] sm:$0xff] }
 0x211   :  { %1887 = vmatprep.subr.bf16.mxu0 %v2100_v0  ;;  %v1924_v12 = vpack.c.bf16 %v692_v11, %v691_v10  ;;  %v877_v11 = vld [vmem:[#allocation2 + $0x4c0] sm:$0xff] }
 0x214   :  { %1889 = vmatpush3.bf16.msra.mxu0 %v1888_v14  ;;  %v694_v14 = vld [vmem:[#allocation2 + $0x3c8] sm:$0xff] }
 0x215   :  { %1590 = vmatprep.subr.mxu0 %v2102_v1  ;;  %v1927_v15 = vpack.c.bf16 %v694_v14, %v693_v13  ;;  %v1186_v14 = vld [vmem:[#allocation2 + $0x607] ss:$0 sm:$0xff] }
 0x2ca   :  { %v297_v2 = vpop.f32.mrb[2].mxu0 }
 0x2cb   :  { %v298_v3 = vadd.f32 %v1180_v63, %v297_v2  ;;  %v1484_v4 = vpop.f32.mrb[3].mxu0  ;;  %v685_v2 = vld [vmem:[#allocation2 + $0x380] sm:$0xff] }
 0x2cc   :  { %v687_v4 = vld [vmem:[#allocation2 + $0x390] sm:$0xff] }
 0x2cd   :  { %2049 = vtanh.f32 %v298_v3  ;;  %v686_v3 = vld [vmem:[#allocation2 + $0x388] sm:$0xff]  ;;  %v1918_v7 = vpack.c.bf16 %v688_v6, %v687_v4  ;;  %v872_v4 = vld [vmem:[#allocation2 + $0x498] sm:$0xff]  ;;  %v873_v6 = vld [vmem:[#allocation2 + $0x4a0] sm:$0xff] }
 0x2d7   :  { %v2050_v5 = vpop.eup %2049 }
 0x2d8   :  { %1518 = vmatmul.mubr.f32.vlgmr.msra.gmra.mrb[2].mxu1 %v2050_v5  ;;  %v1915_v5 = vpack.c.bf16 %v686_v3, %v685_v2  ;;  %v871_v2 = vld [vmem:[#allocation2 + $0x490] sm:$0xff] }
 0x2d9   :  { %1587 = vmatprep.mubr.msk.f32.mxu1 %vm2101_vm0, %v2102_v1  ;;  %1892 = vmatpush3.bf16.msra.mxu1 %v1891_v18 }
 0x2da   :  { %1893 = vmatprep.subr.bf16.mxu1 %v2100_v0 }
 0x2dd   :  { %1895 = vmatpush3.bf16.msra.mxu1 %v1894_v20 }
 0x2de   :  { %1896 = vmatprep.subr.bf16.mxu1 %v2100_v0 }
 0x2e1   :  { %1898 = vmatpush3.bf16.msra.mxu1 %v1897_v23  ;;  %v696_v23 = vld [vmem:[#allocation2 + $0x3d8] sm:$0xff] }
 0x2e2   :  { %1899 = vmatprep.subr.bf16.mxu1 %v2100_v0  ;;  %v1930_v24 = vpack.c.bf16 %v696_v23, %v695_v22  ;;  %v881_v23 = vld [vmem:[#allocation2 + $0x4e0] sm:$0xff] }
 0x2e5   :  { %1901 = vmatpush3.bf16.msra.mxu1 %v1900_v26  ;;  %v698_v26 = vld [vmem:[#allocation2 + $0x3e8] sm:$0xff] }
 0x2e6   :  { %1902 = vmatprep.subr.bf16.mxu1 %v2100_v0  ;;  %v1933_v27 = vpack.c.bf16 %v698_v26, %v697_v25  ;;  %v883_v26 = vld [vmem:[#allocation2 + $0x4f0] sm:$0xff] }
 0x2e9   :  { %1904 = vmatpush3.bf16.msra.mxu1 %v1903_v29  ;;  %v700_v29 = vld [vmem:[#allocation2 + $0x3f8] sm:$0xff] }
 0x2ea   :  { %1905 = vmatprep.subr.bf16.mxu1 %v2100_v0 }
 0x2ed   :  { %1907 = vmatpush3.bf16.msra.mxu1 %v1906_v38  ;;  %v781_v38 = vld [vmem:[#allocation2 + $0x420] sm:$0xff] }
 0x2ee   :  { %1908 = vmatprep.subr.bf16.mxu1 %v2100_v0  ;;  %v1945_v40 = vpack.c.bf16 %v782_v39, %v781_v38  ;;  %v967_v39 = vld [vmem:[#allocation2 + $0x530] sm:$0xff] }
 0x2f1   :  { %1910 = vmatpush3.bf16.msra.mxu1 %v1909_v42  ;;  %v783_v42 = vld [vmem:[#allocation2 + $0x430] sm:$0xff] }
 0x2f2   :  { %1911 = vmatprep.subr.bf16.mxu1 %v2100_v0  ;;  %v1948_v44 = vpack.c.bf16 %v784_v43, %v783_v42  ;;  %v969_v43 = vld [vmem:[#allocation2 + $0x540] sm:$0xff] }
 0x2f5   :  { %1913 = vmatpush3.bf16.msra.mxu1 %v1912_v45  ;;  %v785_v45 = vld [vmem:[#allocation2 + $0x440] sm:$0xff] }
 0x2f6   :  { %1914 = vmatprep.subr.bf16.mxu1 %v2100_v0 }
 0x3ab   :  { %v389_v31 = vpop.f32.mrb[2].mxu1 }
 0x3ac   :  { %v390_v32 = vadd.f32 %v1181_v30, %v389_v31  ;;  %v1519_v33 = vpop.f32.mrb[3].mxu1  ;;  %v1936_v30 = vpack.c.bf16 %v700_v29, %v699_v28  ;;  %v777_v31 = vld [vmem:[#allocation2 + $0x400] sm:$0xff] }
 0x3ad   :  { %v779_v33 = vld [vmem:[#allocation2 + $0x410] sm:$0xff]  ;;  %v961_v29 = vld [vmem:[#allocation2 + $0x500] sm:$0xff] }
 0x3ae   :  { %2051 = vtanh.f32 %v390_v32  ;;  %v778_v32 = vld [vmem:[#allocation2 + $0x408] sm:$0xff]  ;;  %v1942_v36 = vpack.c.bf16 %v780_v35, %v779_v33  ;;  %v964_v33 = vld [vmem:[#allocation2 + $0x518] sm:$0xff]  ;;  %v965_v35 = vld [vmem:[#allocation2 + $0x520] sm:$0xff] }
 0x3b8   :  { %v2052_v34 = vpop.eup %2051 }
 0x3b9   :  { %1553 = vmatmul.mubr.f32.vlgmr.msra.gmra.mrb[4].mxu0 %v2052_v34  ;;  %v1939_v34 = vpack.c.bf16 %v778_v32, %v777_v31  ;;  %v963_v31 = vld [vmem:[#allocation2 + $0x510] sm:$0xff] }
 0x3ba   :  { %1592 = vmatprep.mubr.msk.f32.mxu0 %vm2101_vm0, %v2102_v1  ;;  %1591 = vmatpush3.msra.mxu0 %v603_v58 }
 0x3bb   :  { %1938 = vmatprep.subr.bf16.mxu0 %v2100_v0 }
 0x48c   :  { %v481_v47 = vpop.f32.mrb[4].mxu0 }
 0x48d   :  { %v482_v48 = vadd.f32 %v1182_v46, %v481_v47  ;;  %v1554_v49 = vpop.f32.mrb[5].mxu0  ;;  %v786_v46 = vld [vmem:[#allocation2 + $0x448] sm:$0xff] }
 0x48e   :  { %v1951_v47 = vpack.c.bf16 %v786_v46, %v785_v45  ;;  %v1187_v46 = vld [vmem:[#allocation2 + $0x608] ss:$0 sm:$0xff] }
 0x48f   :  { %2053 = vtanh.f32 %v482_v48  ;;  %v1184_v48 = vld [vmem:[#allocation2 + $0x606] ss:$0 sm:$0xff] }
 0x499   :  { %v2054_v50 = vpop.eup %2053 }
 0x49a   :  { %1588 = vmatmul.mubr.f32.vlgmr.msra.gmra.mrb[4].mxu1 %v2054_v50 }
 0x49b   :  { %1627 = vmatprep.mubr.msk.f32.mxu1 %vm2101_vm0, %v2102_v1  ;;  %1916 = vmatpush3.bf16.msra.mxu1 %v1915_v5  ;;  %v1966_v5 = vpack.c.bf16 %v872_v4, %v871_v2  ;;  %v1058_v4 = vld [vmem:[#allocation2 + $0x5a8] sm:$0xff] }
 0x49c   :  { %1917 = vmatprep.subr.bf16.mxu1 %v2100_v0 }
 0x49f   :  { %1919 = vmatpush3.bf16.msra.mxu1 %v1918_v7  ;;  %v874_v7 = vld [vmem:[#allocation2 + $0x4a8] sm:$0xff] }
 0x4a0   :  { %1920 = vmatprep.subr.bf16.mxu1 %v2100_v0 }
 0x56d   :  { %v573_v52 = vpop.f32.mrb[4].mxu1 }
 0x56e   :  { %v2210_v53 = vadd.f32 %v1183_v51, %v573_v52  ;;  %v1589_v54 = vpop.f32.mrb[5].mxu1 }
 0x56f   :  { %v788_v54 = vld [vmem:[#allocation2 + $0x458] sm:$0xff] }
 0x570   :  { %v590_v55 = vmul.f32 0.5, %v2210_v53  ;;  %v578_v63 = vsel %vm577_vm1, %v2210_v53, -inf }
 0x572   :  { %v591_v56 = vmul.f32 1.442695, %v590_v55 }
 0x574   :  { %2055 = vpow2.f32 %v591_v56  ;;  %v789_v56 = vld [vmem:[#allocation2 + $0x460] sm:$0xff] }
 0x57e   :  { %v2056_v57 = vpop.eup %2055 }
 0x57f   :  { %594 = vrot.lane.b32.xlu0 %v2056_v57, %s2103_s0  ;;  %v790_v57 = vld [vmem:[#allocation2 + $0x468] sm:$0xff] }
 0x580   :  { %v1957_v58 = vpack.c.bf16 %v790_v57, %v789_v56  ;;  %v975_v57 = vld [vmem:[#allocation2 + $0x570] sm:$0xff] }
 0x583   :  { %599 = vrot.lane.b32.xlu0 %v2210_v53, %s2104_s24 }
 0x5f1   :  { %v595_v59 = vpop.permute.xlu0 %594 }
 0x5f2   :  { %v597_v60 = vmul.f32 %v595_v59, %v2156_v41  ;;  %v690_v41 = vld [vmem:[#allocation2 + $0x3a8] sm:$0xff]  ;;  %v791_v59 = vld [vmem:[#allocation2 + $0x470] sm:$0xff] }
 0x5f3   :  { %v1921_v9 = vpack.c.bf16 %v690_v41, %v689_v8  ;;  %v1969_v8 = vpack.c.bf16 %v874_v7, %v873_v6  ;;  %v875_v41 = vld [vmem:[#allocation2 + $0x4b0] sm:$0xff]  ;;  %v1060_v7 = vld [vmem:[#allocation2 + $0x5b8] sm:$0xff] }
 0x5f4   :  { %v1059_v6 = vld [vmem:[#allocation2 + $0x5b0] sm:$0xff] }
 0x5f5   :  { %v600_v61 = vpop.permute.xlu0 %599  ;;  %1922 = vmatpush3.bf16.msra.mxu1 %v1921_v9  ;;  %v876_v9 = vld [vmem:[#allocation2 + $0x4b8] sm:$0xff] }
 0x5f6   :  { %v602_v62 = vadd.f32 %v600_v61, %v597_v60  ;;  %1923 = vmatprep.subr.bf16.mxu1 %v2100_v0  ;;  %v792_v60 = vld [vmem:[#allocation2 + $0x478] sm:$0xff]  ;;  %v1972_v10 = vpack.c.bf16 %v876_v9, %v875_v41  ;;  %v1061_v41 = vld [vmem:[#allocation2 + $0x5c0] sm:$0xff]  ;;  %v1062_v9 = vld [vmem:[#allocation2 + $0x5c8] sm:$0xff] }
 0x5f7   :  { %v1960_v61 = vpack.c.bf16 %v792_v60, %v791_v59  ;;  %v1053_v60 = vld [vmem:[#allocation2 + $0x580] sm:$0xff] }
 0x5f8   :  { %610 = vrot.lane.b32.xlu1 %v602_v62, %s2105_s25  ;;  %v869_v62 = vld [vmem:[#allocation2 + $0x480] sm:$0xff] }
 0x5f9   :  { %1925 = vmatpush3.bf16.msra.mxu1 %v1924_v12  ;;  %v878_v12 = vld [vmem:[#allocation2 + $0x4c8] sm:$0xff] }
 0x5fa   :  { %1926 = vmatprep.subr.bf16.mxu1 %v2100_v0  ;;  %v1975_v13 = vpack.c.bf16 %v878_v12, %v877_v11  ;;  %v1188_v11 = vld [vmem:[#allocation2 + $0x609] ss:$0 sm:$0xff] }
 0x5fd   :  { %1928 = vmatpush3.bf16.msra.mxu1 %v1927_v15 }
 0x5fe   :  { %1929 = vmatprep.subr.bf16.mxu1 %v2100_v0 }
 0x601   :  { %1931 = vmatpush3.bf16.msra.mxu1 %v1930_v24  ;;  %v882_v24 = vld [vmem:[#allocation2 + $0x4e8] sm:$0xff] }
 0x602   :  { %1932 = vmatprep.subr.bf16.mxu1 %v2100_v0  ;;  %v1981_v25 = vpack.c.bf16 %v882_v24, %v881_v23  ;;  %v1067_v23 = vld [vmem:[#allocation2 + $0x5f0] sm:$0xff]  ;;  %v1068_v24 = vld [vmem:[#allocation2 + $0x5f8] sm:$0xff] }
 0x605   :  { %1934 = vmatpush3.bf16.msra.mxu1 %v1933_v27  ;;  %v884_v27 = vld [vmem:[#allocation2 + $0x4f8] sm:$0xff] }
 0x606   :  { %1935 = vmatprep.subr.bf16.mxu1 %v2100_v0  ;;  %v1984_v28 = vpack.c.bf16 %v884_v27, %v883_v26  ;;  %v1189_v26 = vld [vmem:[#allocation2 + $0x60a] ss:$0 sm:$0xff] }
 0x609   :  { %1937 = vmatpush3.bf16.msra.mxu1 %v1936_v30  ;;  %v962_v30 = vld [vmem:[#allocation2 + $0x508] sm:$0xff] }
 0x60a   :  { %1962 = vmatprep.subr.bf16.mxu1 %v2100_v0  ;;  %v1987_v32 = vpack.c.bf16 %v962_v30, %v961_v29 }
 0x61c   :  { %579 = vmax.xlane.f32.xlu1 %v578_v63  ;;  %v870_v63 = vld [vmem:[#allocation2 + $0x488] sm:$0xff] }
 0x61d   :  { %v1963_v3 = vpack.c.bf16 %v870_v63, %v869_v62  ;;  %v1055_v62 = vld [vmem:[#allocation2 + $0x590] sm:$0xff]  ;;  %v1056_v63 = vld [vmem:[#allocation2 + $0x598] sm:$0xff] }
 0x61e   :  { %v2014_v2 = vpack.c.bf16 %v1056_v63, %v1055_v62 }
 0x66a   :  { %v611_v16 = vpop.permute.xlu1 %610 }
 0x66b   :  { %1593 = vmatmul.mubr.msk.f32.vlgmr.msra.gmra.mrb[6].mxu0 %vm577_vm1, %v611_v16 }
 0x66c   :  { %1662 = vmatprep.mubr.msk.f32.mxu0 %vm2101_vm0, %v2102_v1  ;;  %1940 = vmatpush3.bf16.msra.mxu0 %v1939_v34  ;;  %v1990_v34 = vpack.c.bf16 %v964_v33, %v963_v31  ;;  %v1190_v31 = vld [vmem:[#allocation2 + $0x60b] ss:$0 sm:$0xff] }
 0x66d   :  { %1941 = vmatprep.subr.bf16.mxu0 %v2100_v0 }
 0x670   :  { %1943 = vmatpush3.bf16.msra.mxu0 %v1942_v36  ;;  %v966_v36 = vld [vmem:[#allocation2 + $0x528] sm:$0xff] }
 0x671   :  { %1944 = vmatprep.subr.bf16.mxu0 %v2100_v0  ;;  %v1993_v38 = vpack.c.bf16 %v966_v36, %v965_v35 }
 0x674   :  { %1946 = vmatpush3.bf16.msra.mxu0 %v1945_v40  ;;  %v968_v40 = vld [vmem:[#allocation2 + $0x538] sm:$0xff] }
 0x675   :  { %1947 = vmatprep.subr.bf16.mxu0 %v2100_v0  ;;  %v1996_v42 = vpack.c.bf16 %v968_v40, %v967_v39 }
 0x678   :  { %1949 = vmatpush3.bf16.msra.mxu0 %v1948_v44  ;;  %v970_v44 = vld [vmem:[#allocation2 + $0x548] sm:$0xff] }
 0x679   :  { %1950 = vmatprep.subr.bf16.mxu0 %v2100_v0  ;;  %v1999_v45 = vpack.c.bf16 %v970_v44, %v969_v43 }
 0x67c   :  { %1952 = vmatpush3.bf16.msra.mxu0 %v1951_v47 }
 0x67d   :  { %1953 = vmatprep.subr.bf16.mxu0 %v2100_v0 }
 0x6a9   :  { %v580_v17 = vpop.xlane.xlu1 %579 }
 0x6aa   :  { %v2228_v18 = vsub.f32 %v2210_v53, %v580_v17 }
 0x6ac   :  { %v582_v19 = vmul.f32 1.442695, %v2228_v18 }
 0x6ae   :  { %2057 = vpow2.f32 %v582_v19 }
 0x6b8   :  { %v2058_v20 = vpop.eup %2057 }
 0x6b9   :  { %v584_v21 = vsel %vm577_vm1, %v2058_v20, 0.0  ;;  %v879_v20 = vld [vmem:[#allocation2 + $0x4d0] sm:$0xff] }
 0x6ba   :  { %585 = vadd.xlane.f32.xlu0 %v584_v21  ;;  %v880_v21 = vld [vmem:[#allocation2 + $0x4d8] sm:$0xff] }
 0x6bb   :  { %v1978_v22 = vpack.c.bf16 %v880_v21, %v879_v20  ;;  %v1065_v20 = vld [vmem:[#allocation2 + $0x5e0] sm:$0xff]  ;;  %v1066_v21 = vld [vmem:[#allocation2 + $0x5e8] sm:$0xff] }
 0x6d0   :  { %1148 = vrot.lane.b32.xlu0 %v2210_v53, %s2106_s26 }
 0x6d4   :  { %1159 = vrot.lane.b32.xlu0 %v2210_v53, %s2107_s27  ;;  %v787_v53 = vld [vmem:[#allocation2 + $0x450] sm:$0xff] }
 0x6d5   :  { %v1954_v55 = vpack.c.bf16 %v788_v54, %v787_v53  ;;  %v973_v54 = vld [vmem:[#allocation2 + $0x560] sm:$0xff] }
 0x6d7   :  { %1955 = vmatpush3.bf16.msra.mxu0 %v1954_v55  ;;  %v974_v55 = vld [vmem:[#allocation2 + $0x568] sm:$0xff] }
 0x6d8   :  { %1956 = vmatprep.subr.bf16.mxu0 %v2100_v0  ;;  %v2005_v56 = vpack.c.bf16 %v974_v55, %v973_v54 }
 0x6db   :  { %1958 = vmatpush3.bf16.msra.mxu0 %v1957_v58  ;;  %v976_v58 = vld [vmem:[#allocation2 + $0x578] sm:$0xff] }
 0x6dc   :  { %1959 = vmatprep.subr.bf16.mxu0 %v2100_v0  ;;  %v2008_v59 = vpack.c.bf16 %v976_v58, %v975_v57 }
 0x6df   :  { %1961 = vmatpush3.bf16.msra.mxu0 %v1960_v61  ;;  %v1054_v61 = vld [vmem:[#allocation2 + $0x588] sm:$0xff] }
 0x6e0   :  { %1986 = vmatprep.subr.bf16.mxu0 %v2100_v0 }
 0x73e   :  { %v680_v49 = vpop.f32.mrb[6].mxu0 }
 0x73f   :  { %v681_v50 = vadd.f32 %v1184_v48, %v680_v49  ;;  %v1594_v51 = vpop.f32.mrb[7].mxu0 }
 0x740   :  { %v971_v51 = vld [vmem:[#allocation2 + $0x550] sm:$0xff] }
 0x741   :  { %2059 = vtanh.f32 %v681_v50 }
 0x747   :  { %v586_v33 = vpop.xlane.xlu0 %585 }
 0x74b   :  { %v2060_v52 = vpop.eup %2059  ;;  %v1149_v44 = vpop.permute.xlu0 %1148 }
 0x74c   :  { %1628 = vmatmul.mubr.f32.vlgmr.msra.gmra.mrb[6].mxu1 %v2060_v52  ;;  %v972_v52 = vld [vmem:[#allocation2 + $0x558] sm:$0xff] }
 0x74d   :  { %1697 = vmatprep.mubr.msk.f32.mxu1 %vm2101_vm0, %v2102_v1  ;;  %1964 = vmatpush3.bf16.msra.mxu1 %v1963_v3  ;;  %v2002_v53 = vpack.c.bf16 %v972_v52, %v971_v51  ;;  %v1057_v3 = vld [vmem:[#allocation2 + $0x5a0] sm:$0xff] }
 0x74e   :  { %1965 = vmatprep.subr.bf16.mxu1 %v2100_v0 }
 0x751   :  { %1967 = vmatpush3.bf16.msra.mxu1 %v1966_v5  ;;  %v2017_v5 = vpack.c.bf16 %v1058_v4, %v1057_v3 }
 0x752   :  { %1968 = vmatprep.subr.bf16.mxu1 %v2100_v0 }
 0x755   :  { %1970 = vmatpush3.bf16.msra.mxu1 %v1969_v8  ;;  %v2020_v8 = vpack.c.bf16 %v1060_v7, %v1059_v6 }
 0x756   :  { %1971 = vmatprep.subr.bf16.mxu1 %v2100_v0 }
 0x759   :  { %1973 = vmatpush3.bf16.msra.mxu1 %v1972_v10  ;;  %v2023_v10 = vpack.c.bf16 %v1062_v9, %v1061_v41 }
 0x75a   :  { %1974 = vmatprep.subr.bf16.mxu1 %v2100_v0 }
 0x75d   :  { %1976 = vmatpush3.bf16.msra.mxu1 %v1975_v13 }
 0x75e   :  { %1977 = vmatprep.subr.bf16.mxu1 %v2100_v0 }
 0x761   :  { %1979 = vmatpush3.bf16.msra.mxu1 %v1978_v22  ;;  %v2029_v22 = vpack.c.bf16 %v1066_v21, %v1065_v20 }
 0x762   :  { %1980 = vmatprep.subr.bf16.mxu1 %v2100_v0 }
 0x765   :  { %1982 = vmatpush3.bf16.msra.mxu1 %v1981_v25  ;;  %v2032_v25 = vpack.c.bf16 %v1068_v24, %v1067_v23 }
 0x766   :  { %1983 = vmatprep.subr.bf16.mxu1 %v2100_v0 }
 0x769   :  { %1985 = vmatpush3.bf16.msra.mxu1 %v1984_v28 }
 0x76a   :  { %2010 = vmatprep.subr.bf16.mxu1 %v2100_v0 }
 0x81f   :  { %v772_v15 = vpop.f32.mrb[6].mxu1 }
 0x820   :  { %v773_v16 = vadd.f32 %v1186_v14, %v772_v15  ;;  %v1629_v17 = vpop.f32.mrb[7].mxu1 }
 0x821   :  { %v1064_v17 = vld [vmem:[#allocation2 + $0x5d8] sm:$0xff] }
 0x822   :  { %2061 = vtanh.f32 %v773_v16  ;;  %v1063_v16 = vld [vmem:[#allocation2 + $0x5d0] sm:$0xff] }
 0x82c   :  { %v2062_v19 = vpop.eup %2061 }
 0x82d   :  { %1663 = vmatmul.mubr.f32.vlgmr.msra.gmra.mrb[8].mxu0 %v2062_v19  ;;  %v2026_v19 = vpack.c.bf16 %v1064_v17, %v1063_v16 }
 0x82e   :  { %1732 = vmatprep.mubr.msk.f32.mxu0 %vm2101_vm0, %v2102_v1  ;;  %1988 = vmatpush3.bf16.msra.mxu0 %v1987_v32 }
 0x82f   :  { %1989 = vmatprep.subr.bf16.mxu0 %v2100_v0 }
 0x832   :  { %1991 = vmatpush3.bf16.msra.mxu0 %v1990_v34 }
 0x833   :  { %1992 = vmatprep.subr.bf16.mxu0 %v2100_v0 }
 0x836   :  { %1994 = vmatpush3.bf16.msra.mxu0 %v1993_v38 }
 0x837   :  { %1995 = vmatprep.subr.bf16.mxu0 %v2100_v0 }
 0x83a   :  { %1997 = vmatpush3.bf16.msra.mxu0 %v1996_v42 }
 0x83b   :  { %1998 = vmatprep.subr.bf16.mxu0 %v2100_v0 }
 0x83e   :  { %2000 = vmatpush3.bf16.msra.mxu0 %v1999_v45 }
 0x83f   :  { %2001 = vmatprep.subr.bf16.mxu0 %v2100_v0 }
 0x842   :  { %2003 = vmatpush3.bf16.msra.mxu0 %v2002_v53 }
 0x843   :  { %2004 = vmatprep.subr.bf16.mxu0 %v2100_v0 }
 0x846   :  { %2006 = vmatpush3.bf16.msra.mxu0 %v2005_v56 }
 0x847   :  { %2007 = vmatprep.subr.bf16.mxu0 %v2100_v0 }
 0x84a   :  { %2009 = vmatpush3.bf16.msra.mxu0 %v2008_v59 }
 0x900   :  { %v864_v47 = vpop.f32.mrb[8].mxu0 }
 0x901   :  { %v865_v48 = vadd.f32 %v1187_v46, %v864_v47  ;;  %v1664_v49 = vpop.f32.mrb[9].mxu0  ;;  %v1163_v46 = vsel %vm1162_vm2, %v2180_v37, %v1149_v44 }
 0x902   :  { %v1160_v49 = vpop.permute.xlu0 %1159 }
 0x903   :  { %2063 = vtanh.f32 %v865_v48 }
 0x90d   :  { %v2064_v50 = vpop.eup %2063 }
 0x90e   :  { %1698 = vmatmul.mubr.f32.vlgmr.msra.gmra.mrb[8].mxu1 %v2064_v50 }
 0x90f   :  { %1767 = vmatprep.mubr.msk.f32.mxu1 %vm2101_vm0, %v2102_v1  ;;  %v2011_v1 = vpack.c.bf16 %v1054_v61, %v1053_v60 }
 0x911   :  { %2012 = vmatpush3.bf16.msra.mxu1 %v2011_v1 }
 0x912   :  { %2013 = vmatprep.subr.bf16.mxu1 %v2100_v0 }
 0x915   :  { %2015 = vmatpush3.bf16.msra.mxu1 %v2014_v2 }
 0x916   :  { %2016 = vmatprep.subr.bf16.mxu1 %v2100_v0 }
 0x919   :  { %2018 = vmatpush3.bf16.msra.mxu1 %v2017_v5 }
 0x91a   :  { %2019 = vmatprep.subr.bf16.mxu1 %v2100_v0 }
 0x91d   :  { %2021 = vmatpush3.bf16.msra.mxu1 %v2020_v8 }
 0x91e   :  { %2022 = vmatprep.subr.bf16.mxu1 %v2100_v0 }
 0x921   :  { %2024 = vmatpush3.bf16.msra.mxu1 %v2023_v10 }
 0x922   :  { %2025 = vmatprep.subr.bf16.mxu1 %v2100_v0 }
 0x925   :  { %2027 = vmatpush3.bf16.msra.mxu1 %v2026_v19 }
 0x926   :  { %2028 = vmatprep.subr.bf16.mxu1 %v2100_v0 }
 0x929   :  { %2030 = vmatpush3.bf16.msra.mxu1 %v2029_v22 }
 0x92a   :  { %2031 = vmatprep.subr.bf16.mxu1 %v2100_v0 }
 0x92d   :  { %2033 = vmatpush3.bf16.msra.mxu1 %v2032_v25 }
 0x9e1   :  { %v956_v12 = vpop.f32.mrb[8].mxu1 }
 0x9e2   :  { %v957_v13 = vadd.f32 %v1188_v11, %v956_v12  ;;  %v1699_v14 = vpop.f32.mrb[9].mxu1 }
 0x9e4   :  { %2065 = vtanh.f32 %v957_v13 }
 0x9ee   :  { %v2066_v15 = vpop.eup %2065 }
 0x9ef   :  { %1733 = vmatmul.mubr.f32.vlgmr.msra.gmra.mrb[10].mxu0 %v2066_v15 }
 0xac2   :  { %v1048_v27 = vpop.f32.mrb[10].mxu0 }
 0xac3   :  { %v1049_v28 = vadd.f32 %v1189_v26, %v1048_v27  ;;  %v1734_v29 = vpop.f32.mrb[11].mxu0 }
 0xac5   :  { %2067 = vtanh.f32 %v1049_v28 }
 0xac6   :  { %2069 = vlog2.f32 %v586_v33 }
 0xacf   :  { %v2068_v30 = vpop.eup %2067 }
 0xad0   :  { %1768 = vmatmul.mubr.f32.vlgmr.msra.gmra.mrb[10].mxu1 %v2068_v30  ;;  %v2070_v38 = vpop.eup %2069 }
 0xad1   :  { %v588_v0 = vmul.f32 0.6931472, %v2070_v38 }
 0xad3   :  { %v589_v43 = vsub.f32 %v2228_v18, %v588_v0 }
 0xba3   :  { %v1140_v32 = vpop.f32.mrb[10].mxu1 }
 0xba4   :  { %v1141_v34 = vadd.f32 %v1190_v31, %v1140_v32  ;;  %v1769_v35 = vpop.f32.mrb[11].mxu1 }
 0xba6   :  { %v1144_v36 = vmul.f32 0.5, %v1141_v34 }
 0xba8   :  { %2071 = vtanh.f32 %v1144_v36 }
 0xbb2   :  { %v2072_v39 = vpop.eup %2071 }
 0xbb3   :  { %v1146_v40 = vmul.f32 0.5, %v2072_v39 }
 0xbb5   :  { %v1147_v42 = vadd.f32 0.5, %v1146_v40 }
 0xbb7   :  { %1152 = vrot.lane.b32.xlu1 %v1147_v42, %s2103_s0 }
 0xbbb   :  { %1156 = vrot.lane.b32.xlu1 %v589_v43, %s2107_s27 }
 0xc29   :  { %v1153_v45 = vpop.permute.xlu1 %1152 }
 0xc2a   :  { %v1165_v47 = vsel %vm1164_vm3, %v1163_v46, %v1153_v45 }
 0xc2d   :  { %v1157_v48 = vpop.permute.xlu1 %1156 }
 0xc2e   :  { %v1167_v50 = vsel %vm1166_vm4, %v1165_v47, %v1157_v48 }
 0xc2f   :  { %v1169_v51 = vsel %vm1168_vm5, %v1167_v50, %v1160_v49 }
 0xc30   :  { %v1171_v52 = vsel %vm1170_vm6, %v1169_v51, 0.0 }
 0xc31   :  { %1172 = vst [vmem:[%s2283_s2] sm:$0xff] %v1171_v52 }
 0xc32   :  { %1177 = vsyncpa [#allocation3], 1 }

</bundles_post_ra>
